<compile_context>
chip_gen: v7x
topology: tpu7x:2x2x1
jax: 0.10.0
libtpu: 0.0.40
codegen_flags: <defaults>
</compile_context>

<pallas_src>
import functools

import numpy as np
import jax
import jax.numpy as jnp
from jax.experimental import pallas as pl
from jax.experimental.pallas import tpu as pltpu


def _round_up(x, m):
    return ((x + m - 1) // m) * m


def _taylor_kernel(x_ref, coeffs_ref, bias_ref, o_ref, *, num_pows,
                   expansion_point, compute_dtype):
    """One tile of rows: shift, power recurrence, per-power MXU matmuls, bias add."""
    # Shift + power recurrence in f32 (accuracy; v5e VPU is f32-only).
    x = x_ref[...].astype(jnp.float32) - jnp.float32(expansion_point)
    xp = x
    acc = jnp.dot(xp.astype(compute_dtype), coeffs_ref[0],
                  preferred_element_type=jnp.float32)
    for k in range(1, num_pows):
        xp = xp * x
        acc = acc + jnp.dot(xp.astype(compute_dtype), coeffs_ref[k],
                            preferred_element_type=jnp.float32)
    # bias_ref is (1, out) — broadcasts over the row tile; includes the folded k=0 term.
    o_ref[...] = (acc + bias_ref[...]).astype(o_ref.dtype)


def _pick_tile_m(n, stream_row_bytes, vmem_row_bytes, tile_m):
    """Row-tile size: amortize per-step overhead, stay inside VMEM, allow >=2 tiles."""
    if tile_m is not None:
        tm = int(tile_m)
    else:
        # ~0.35us grid-step overhead @ >1 TB/s HBM  ->  aim for >=512 KiB streamed/step.
        target = (512 * 1024) // max(stream_row_bytes, 1)
        # Keep double-buffered tiles + in-kernel f32 temporaries well inside scoped VMEM.
        cap = (8 * 2 ** 20) // max(vmem_row_bytes, 1)
        tm = min(max(target, 8), max(cap, 8), 8192)
    tm = min(tm, max(n, 1))
    if n >= 16:
        tm = min(tm, -(-n // 2))      # keep >=2 grid steps so both cores get rows
    return max(_round_up(tm, 8), 8)


def taylor_layer(x, coeffs, bias=None, *, expansion_point=0.0, tile_m=None,
                 compute_dtype=jnp.float32, out_dtype=jnp.float32):
    """Pallas TaylorLayer forward.

    Args:
      x:      (..., input_dim) array (any float dtype; streamed in its native dtype).
      coeffs: (out_dim, input_dim, order) — same convention as the PyTorch nn.Parameter.
      bias:   (1, out_dim) or None.
      compute_dtype: dtype of the MXU operands (float32 = bit-faithful vs. the reference,
                     bfloat16 = full-rate MXU on v6e/v7x; kernel is memory-bound either way).
    Returns:
      (..., out_dim) array of `out_dtype`.
    """
    *lead, input_dim = x.shape
    out_dim, in_dim_c, order = coeffs.shape
    assert in_dim_c == input_dim

    coeffs = coeffs.astype(jnp.float32)
    x2 = x.reshape(-1, input_dim)           # free reshape (feature dim preserved)
    n = x2.shape[0]

    # ---- fold the k=0 (constant) term into the bias ----
    bias_eff = coeffs[:, :, 0].sum(axis=1)                   # sum_i coeffs[o, i, 0]
    if bias is not None:
        bias_eff = bias_eff + bias.reshape(-1).astype(jnp.float32)

    # ---- coeffs for k=1..order-1 as (num_pows, D, out) matmul operands ----
    num_pows = max(order - 1, 1)
    if order > 1:
        coeffs_pows = jnp.transpose(coeffs[:, :, 1:], (2, 1, 0))   # (order-1, D, out)
    else:
        # order == 1: output is just the folded constant; keep a zero matmul for shape sanity.
        coeffs_pows = jnp.zeros((1, input_dim, out_dim), jnp.float32)

    # ---- lane-dense output only when padding overhead is small (<= 25%) ----
    out_eff = out_dim
    pad128 = _round_up(out_dim, 128)
    if pad128 != out_dim and (pad128 - out_dim) * 4 <= out_dim:
        out_eff = pad128
        coeffs_pows = jnp.pad(coeffs_pows, ((0, 0), (0, 0), (0, out_eff - out_dim)))
        bias_eff = jnp.pad(bias_eff, (0, out_eff - out_dim))

    coeffs_pows = coeffs_pows.astype(compute_dtype)
    bias_eff = bias_eff.reshape(1, out_eff).astype(jnp.float32)

    # ---- row tile ----
    x_item = np.dtype(x2.dtype).itemsize
    out_item = np.dtype(out_dtype).itemsize
    stream_row = input_dim * x_item + out_eff * out_item
    vmem_row = 2 * (input_dim * x_item + out_eff * out_item) + 2 * input_dim * 4
    tm = _pick_tile_m(n, stream_row, vmem_row, tile_m)
    grid = (pl.cdiv(n, tm),)                 # ragged tail handled by partial-block masking

    # ---- VMEM budget: double-buffered x/out tiles + resident coeffs/bias + f32 temps ----
    est = (2 * tm * input_dim * x_item
           + 2 * tm * out_eff * out_item
           + 2 * num_pows * input_dim * out_eff * np.dtype(compute_dtype).itemsize
           + 2 * out_eff * 4
           + 2 * tm * input_dim * 4)
    vmem_limit = int(min(max(4 * est, 16 * 2 ** 20), 48 * 2 ** 20))

    kernel = functools.partial(
        _taylor_kernel, num_pows=num_pows,
        expansion_point=float(expansion_point), compute_dtype=compute_dtype)

    out = pl.pallas_call(
        kernel,
        out_shape=jax.ShapeDtypeStruct((n, out_eff), out_dtype),
        grid_spec=pltpu.PrefetchScalarGridSpec(
            num_scalar_prefetch=0,
            grid=grid,
            in_specs=[
                pl.BlockSpec((tm, input_dim), lambda i: (i, 0)),              # x rows tile
                pl.BlockSpec((num_pows, input_dim, out_eff),
                             lambda i: (0, 0, 0)),                            # coeffs (resident)
                pl.BlockSpec((1, out_eff), lambda i: (0, 0)),                 # bias (+ folded k=0)
            ],
            out_specs=pl.BlockSpec((tm, out_eff), lambda i: (i, 0)),
        ),
        compiler_params=pltpu.CompilerParams(
            dimension_semantics=("parallel",),
            vmem_limit_bytes=vmem_limit),
    )(x2, coeffs_pows, bias_eff)

    if out_eff != out_dim:
        out = out[:, :out_dim]
    return out.reshape(*lead, out_dim)


def _reference(x, coeffs, bias, expansion_point):
    """Pure-JAX replica of the PyTorch forward for verification."""
    *lead, input_dim = x.shape
    out_dim, _, order = coeffs.shape
    xs = x.reshape(-1, input_dim).astype(jnp.float32) - expansion_point
    y = jnp.zeros((xs.shape[0], out_dim), jnp.float32)
    for k in range(order):
        y = y + (xs ** k) @ coeffs[:, :, k].T
    if bias is not None:
        y = y + bias
    return y.reshape(*lead, out_dim)


if __name__ == "__main__":
    key = jax.random.PRNGKey(0)
    k_coeff, k_x = jax.random.split(key)

    input_dim, out_dim, order = 32, 16, 3
    expansion_point = 0.25

    # Deterministic "init": coeffs ~ N(0,1)*0.01, bias = zeros (as in __init__).
    coeffs = jax.random.normal(k_coeff, (out_dim, input_dim, order), jnp.float32) * 0.01
    bias = jnp.zeros((1, out_dim), jnp.float32)

    # Small input with leading batch/seq dims, feature dim last.
    x = jax.random.normal(k_x, (2, 8, input_dim), jnp.float32)

    y_ref = _reference(x, coeffs, bias, expansion_point)

    # Default f32-operand path: matches the f32 reference tightly.
    y32 = jax.block_until_ready(
        taylor_layer(x, coeffs, bias, expansion_point=expansion_point))
    assert y32.shape == (2, 8, out_dim)
    assert jnp.allclose(y32, y_ref, atol=1e-5, rtol=1e-5), "f32 path mismatch vs reference"

    # bf16-operand path (full-rate MXU on v6e/v7x): looser tolerance.
    ybf = jax.block_until_ready(
        taylor_layer(x, coeffs, bias, expansion_point=expansion_point,
                     compute_dtype=jnp.bfloat16))
    assert ybf.shape == (2, 8, out_dim)
    assert jnp.allclose(ybf, y_ref, atol=1e-2, rtol=5e-2), "bf16 path mismatch vs reference"

    print("KERNEL_OK")
</pallas_src>

<mosaic_0001>
module attributes {stable_mosaic.version = 11 : i64} {
  func.func @_taylor_kernel(%arg0: i32, %arg1: memref<8x32xf32, #tpu.memory_space<vmem>>, %arg2: memref<2x32x16xf32, #tpu.memory_space<vmem>>, %arg3: memref<1x16xf32, #tpu.memory_space<vmem>>, %arg4: memref<8x16xf32, #tpu.memory_space<vmem>>) attributes {dimension_semantics = [#tpu.dimension_semantics<parallel>], iteration_bounds = array<i64: 2>, scalar_prefetch = 0 : i64, scratch_operands = 0 : i64, tpu.core_type = #tpu.core_type<tc>, window_params = [{transform_indices = @transform_0, window_bounds = array<i64: 8, 32>}, {pipeline_mode = #tpu.pipeline_mode<synchronous>, transform_indices = @transform_1, window_bounds = array<i64: 2, 32, 16>}, {pipeline_mode = #tpu.pipeline_mode<synchronous>, transform_indices = @transform_2, window_bounds = array<i64: 1, 16>}, {transform_indices = @transform_3, window_bounds = array<i64: 8, 16>}]} {
    %c0 = arith.constant 0 : index
    %c0_0 = arith.constant 0 : index
    %0 = vector.load %arg1[%c0, %c0_0] : memref<8x32xf32, #tpu.memory_space<vmem>>, vector<8x32xf32>
    %cst = arith.constant 2.500000e-01 : f32
    %1 = vector.broadcast %cst : f32 to vector<8x32xf32>
    %2 = arith.subf %0, %1 : vector<8x32xf32>
    %c0_1 = arith.constant 0 : index
    %c0_2 = arith.constant 0 : index
    %c0_3 = arith.constant 0 : index
    %3 = vector.load %arg2[%c0_1, %c0_2, %c0_3] : memref<2x32x16xf32, #tpu.memory_space<vmem>>, vector<1x32x16xf32>
    %4 = vector.shape_cast %3 : vector<1x32x16xf32> to vector<32x16xf32>
    %cst_4 = arith.constant dense<0.000000e+00> : vector<8x16xf32>
    %5 = tpu.matmul %2, %4, %cst_4 {dimension_numbers = #tpu.dot_dimension_numbers<[1], [0], [0], [1], [0, 0, 1, 1], [], []>} : vector<8x32xf32>, vector<32x16xf32>, vector<8x16xf32> -> vector<8x16xf32>
    %6 = arith.mulf %2, %2 : vector<8x32xf32>
    %c1 = arith.constant 1 : index
    %c0_5 = arith.constant 0 : index
    %c0_6 = arith.constant 0 : index
    %7 = vector.load %arg2[%c1, %c0_5, %c0_6] : memref<2x32x16xf32, #tpu.memory_space<vmem>>, vector<1x32x16xf32>
    %8 = vector.shape_cast %7 : vector<1x32x16xf32> to vector<32x16xf32>
    %cst_7 = arith.constant dense<0.000000e+00> : vector<8x16xf32>
    %9 = tpu.matmul %6, %8, %cst_7 {dimension_numbers = #tpu.dot_dimension_numbers<[1], [0], [0], [1], [0, 0, 1, 1], [], []>} : vector<8x32xf32>, vector<32x16xf32>, vector<8x16xf32> -> vector<8x16xf32>
    %10 = arith.addf %5, %9 : vector<8x16xf32>
    %c0_8 = arith.constant 0 : index
    %c0_9 = arith.constant 0 : index
    %11 = vector.load %arg3[%c0_8, %c0_9] : memref<1x16xf32, #tpu.memory_space<vmem>>, vector<1x16xf32>
    %12 = vector.broadcast %11 : vector<1x16xf32> to vector<8x16xf32>
    %13 = arith.addf %10, %12 : vector<8x16xf32>
    %c0_10 = arith.constant 0 : index
    %c0_11 = arith.constant 0 : index
    %14 = vector.load %arg4[%c0_10, %c0_11] : memref<8x16xf32, #tpu.memory_space<vmem>>, vector<8x16xf32>
    tpu.vector_store %arg4[%c0_10, %c0_11], %13 {strides = array<i32>} : memref<8x16xf32, #tpu.memory_space<vmem>>, vector<8x16xf32>,
    return
  }
  func.func @transform_0(%arg0: i32) -> (i32, i32) {
    %c0_i32 = arith.constant 0 : i32
    %c0_i32_0 = arith.constant 0 : i32
    return %arg0, %c0_i32 : i32, i32
  }
  func.func @transform_1(%arg0: i32) -> (i32, i32, i32) {
    %c0_i32 = arith.constant 0 : i32
    %c0_i32_0 = arith.constant 0 : i32
    %c0_i32_1 = arith.constant 0 : i32
    %c0_i32_2 = arith.constant 0 : i32
    return %c0_i32, %c0_i32_0, %c0_i32_1 : i32, i32, i32
  }
  func.func @transform_2(%arg0: i32) -> (i32, i32) {
    %c0_i32 = arith.constant 0 : i32
    %c0_i32_0 = arith.constant 0 : i32
    %c0_i32_1 = arith.constant 0 : i32
    return %c0_i32, %c0_i32_0 : i32, i32
  }
  func.func @transform_3(%arg0: i32) -> (i32, i32) {
    %c0_i32 = arith.constant 0 : i32
    %c0_i32_0 = arith.constant 0 : i32
    return %arg0, %c0_i32 : i32, i32
  }
}

</mosaic_0001>

<bundles_post_ra>
// kernel: tpu_custom_call.1
= control target key start
LH: loop header
LB: loop body
LE: loop exit
PB: predicated region body
PF: predicated region fallthrough
CT: control target
= control target key end

     0   :  { %8 = vsyncpa [#allocation3], 0  ;;  %s727_s0 = inlined_call_operand.vmem [shape: f32[16,32], index: 0, kind: input, shape index: {}]   ;;  %s728_s1 = inlined_call_operand.vmem [shape: f32[2,32,16], index: 1, kind: input, shape index: {}]   ;;  %s729_s2 = inlined_call_operand.vmem [shape: f32[1,16], index: 2, kind: input, shape index: {}]   ;;  %s730_s3 = inlined_call_operand.hbm [shape: f32[16,16], index: 3, kind: output, shape index: {}]  }
   0x1   :  { %10 = vsyncpa [#allocation3 + $0x1], 0  ;;  %s600_s12 = smov 0   ;;  %s602_s13 = smov 0  }
   0x2   :  { %s604_s14 = smov 0   ;;  %s606_s15 = smov 0  }
   0x3 LB: > { %s621_s16 = sadd.s32 4294967295, %s574_s15   ;;  %s408_s17 = sadd.s32 4294967294, %s574_s15   ;;  %s574_s15 = sphi %s606_s15, %s736_s15   ;;  %s570_s14 = sphi %s604_s14, %s735_s14   ;;  %s566_s13 = sphi %s602_s13, %s734_s13   ;;  %s562_s12 = sphi %s600_s12, %s733_s12  }
   0x4   : > { %s625_s18 = sadd.s32 1, %s574_s15   ;;  %s91_s19 = sadd.s32 1, %s570_s14 }
   0x5   : > { %s88_s20 = ssub.s32 %s574_s15, %s625_s18  ;;  %p101_p0 = scmp.ne.s32.totalorder %s570_s14, %s566_s13 }
   0x6   : > { %p89_p1 = scmp.eq.s32.totalorder %s88_s20, 0  ;;  %p102_p2 = scmp.eq.s32.totalorder %s621_s16, 1 }
   0x7   : > { %p107_p3 = scmp.ne.s32.totalorder %s566_s13, %s562_s12  ;;  %p108_p4 = scmp.eq.s32.totalorder %s408_s17, 1 }
   0x8   : > { %s636_s21 = scalar_select %p89_p1, %s570_s14, %s91_s19  }
   0x9   : > { %p638_p5 = por %p102_p2, %p101_p0  ;;  %p642_p6 = por %p108_p4, %p107_p3 }
   0xa   : > { %p411_p7 = scmp.ge.s32.totalorder %s574_s15, 1  ;;  %p139_p8 = scmp.lt.s32.totalorder %s574_s15, 3 }
   0xc   : > { %p140_p9 = pnand %p411_p7, %p139_p8 }
   0xd   : > { %v168_v0 = vld [vmem:[%s728_s1] sm:$0xff] (!%p140_p9)  ;;  %v169_v1 = vld [vmem:[%s728_s1 + $0x8] sm:$0xff] (!%p140_p9)  ;;  %v576_v3 = vmov (!%p140_p9), 0.0|0.0   ;;  %v170_v6 = vld [vmem:[%s728_s1 + $0x10] sm:$0xff] (!%p140_p9)  ;;  %p162_p10 = scmp.lt.s32.totalorder (!%p140_p9), %s621_s16, 1  ;;  %vm577_vm0 = vmmov (!%p140_p9), 0  }
   0xe   : > { %143 = sbr.rel (%p140_p9) target bundleno = 260 (0x104), region = 32  ;;  %v415_v2 = vld [vmem:[%s728_s1 + $0x20] sm:$0xff] (!%p140_p9)  ;;  %464 = vmatprep.subr.bf16.mxu1 (!%p140_p9), %v576_v3  ;;  %458 = vmatprep.subr.bf16.mxu0 (!%p140_p9), %v576_v3  ;;  %v465_v4 = vpack.c.bf16 (!%p140_p9), %v169_v1, %v168_v0  ;;  %v416_v5 = vld [vmem:[%s728_s1 + $0x28] sm:$0xff] (!%p140_p9)  ;;  %v171_v7 = vld [vmem:[%s728_s1 + $0x18] sm:$0xff] (!%p140_p9)  ;;  %v578_v11 = vmov (!%p140_p9), 0.0   ;;  %vm178_vm1 = vcmask (!%p140_p9), 261120  }
   0xf   : > { %v459_v8 = vpack.c.bf16 (!%p140_p9), %v416_v5, %v415_v2  ;;  %v417_v9 = vld [vmem:[%s728_s1 + $0x30] sm:$0xff] (!%p140_p9)  ;;  %v418_v10 = vld [vmem:[%s728_s1 + $0x38] sm:$0xff] (!%p140_p9)  ;;  %455 = vmatprep.mubr.msk.f32.mxu1 (!%p140_p9), %vm577_vm0, %v578_v11  ;;  %444 = vmatprep.mubr.msk.f32.mxu0 (!%p140_p9), %vm577_vm0, %v578_v11  ;;  %v468_v12 = vpack.c.bf16 (!%p140_p9), %v171_v7, %v170_v6  ;;  %s159_s27 = sand.u32 (!%p140_p9), 1, %s566_s13   ;;  %v421_v20 = vld [vmem:[%s729_s2] ss:$0 sm:$0xff] (!%p140_p9)  ;;  %s423_s4 = sshll.u32 (!%p140_p9), %s621_s16, 7 }
  0x10   : > { %466 = vmatpush3.bf16.msra.mxu1 (!%p140_p9), %v465_v4  ;;  %v462_v13 = vpack.c.bf16 (!%p140_p9), %v418_v10, %v417_v9  ;;  %s412_s28 = sshll.u32 (!%p140_p9), %s159_s27, 3  ;;  %vm333_vm2 = vcmask (!%p140_p9), 130048   ;;  %s685_s9 = scalar_lea.hbm (!%p140_p9), %s730_s3, %s423_s4 }
  0x11   : > { %460 = vmatpush3.bf16.msra.mxu0 (!%p140_p9), %v459_v8  ;;  %467 = vmatprep.subr.bf16.mxu1 (!%p140_p9), %v576_v3  ;;  %s161_s5 = scalar_lea.vmem (!%p140_p9), [#allocation2], %s412_s28  ;;  %s336_s10 = scalar_lea.sflag (!%p140_p9), [#allocation3], %s159_s27 }
  0x12   : > { %461 = vmatprep.subr.bf16.mxu0 (!%p140_p9), %v576_v3  ;;  %s349_s6 = sshll.u32 (!%p140_p9), %s161_s5, 4  ;;  %s687_s6 = int_to_ptr.vmem [resolvable:$true] %s349_s6 }
  0x13   : > { %s512_s11 = scalar_lea.vmem (!%p140_p9), %s687_s6, 128 }
  0x14   : > { %469 = vmatpush3.bf16.msra.mxu1 (!%p140_p9), %v468_v12  ;;  %p513_p11 = scmp.ne.s32.totalorder (!%p140_p9), %s687_s6, %s512_s11 }
  0x15   : > { %s163_s19 = scalar_select %p162_p10, %s621_s16, 1  ;;  %463 = vmatpush3.bf16.msra.mxu0 %v462_v13 }
  0x16   : > { %p514_p12 = pnand %p513_p11, %p638_p5  ;;  %s579_s16 = smov [#allocation2]  }
  0x17   : > { %s413_s20 = sshll.u32 %s163_s19, 3  ;;  %s516_s17 = sshll.u32 %s579_s16, 4  ;;  %s517_s17 = int_to_ptr.vmem [resolvable:$false] %s516_s17 }
  0x18   : > { %s165_s26 = scalar_lea.vmem %s727_s0, %s413_s20  ;;  %p515_p13 = pneg %p514_p12 }
  0x19   : > { %v166_v14 = vld [vmem:[%s165_s26] sm:$0xff]  ;;  %s518_s19 = scalar_lea.vmem %s517_s17, 256  ;;  %p519_p0 = scmp.lt.s32.totalorder %s687_s6, %s517_s17 }
  0x1a   : > { %v414_v15 = vadd.f32 -0.25, %v166_v14  ;;  %p520_p1 = scmp.lt.s32.totalorder %s518_s19, %s512_s11 }
  0x1c   : > { %456 = vmatmul.mubr.msk.f32.vlgmr.msra.gmra.mrb[0].mxu1 %vm178_vm1, %v414_v15  ;;  %v172_v16 = vmul.f32 %v414_v15, %v414_v15  ;;  %p521_p2 = por %p520_p1, %p519_p0 }
  0x1e   : > { %445 = vmatmul.mubr.msk.f32.vlgmr.msra.gmra.mrb[0].mxu0 %vm178_vm1, %v172_v16  ;;  %p522_p3 = pnand %p521_p2, %p515_p13 }
  0xef   : > { %v321_v17 = vpop.f32.mrb[0].mxu1 }
  0xf0   : > { %v457_v18 = vpop.f32.mrb[1].mxu1 }
  0xf1   : > { %v248_v19 = vpop.f32.mrb[0].mxu0 }
  0xf2   : > { %v322_v21 = vadd.f32 %v321_v17, %v248_v19  ;;  %v446_v22 = vpop.f32.mrb[1].mxu0 }
  0xf4   : > { %v332_v23 = vadd.f32 %v421_v20, %v322_v21 }
  0xf6   : > { %334 = vst.msk [vmem:[%s161_s5] sm:$0xff] %vm333_vm2, %v332_v23 }
  0xf7   : > { %525 = shalt.err (!%p522_p3)
}
  0xf8   : > { %s526_s20 = scalar_lea.hbm %s685_s9, 128  ;;  %s530_s26 = scalar_lea.hbm %s730_s3, 256 }
  0xf9   : > { %p527_p4 = scmp.ne.s32.totalorder %s685_s9, %s526_s20  ;;  %p531_p9 = scmp.lt.u32.totalorder %s685_s9, %s730_s3 }
  0xfa   : > { %p532_p10 = scmp.lt.u32.totalorder %s530_s26, %s526_s20  ;;  %p534_p12 = scmp.lt.u32.totalorder %s526_s20, %s685_s9 }
  0xfb   : > { %p528_p7 = pnand %p527_p4, %p638_p5 }
  0xfc   : > { %p533_p11 = por %p532_p10, %p531_p9 }
  0xfd   : > { %p529_p8 = pneg %p528_p7 }
  0xfe   : > { %p535_p13 = por %p534_p12, %p533_p11 }
 0x100   : > { %p536_p0 = pnand %p535_p13, %p529_p8 }
 0x102   : > { %539 = shalt.err (!%p536_p0)
}
 0x103   : > { %470 = dma.vmem_to_hbm [thread:$0]  (%p638_p5), %s687_s6, 128, %s685_s9, %s336_s10  }
 0x104 PF: > { %p476_p1 = scmp.ge.s32.totalorder %s574_s15, 2  ;;  %s361_s29 = sand.u32 1, %s562_s12  }
 0x105   : > { %s362_s30 = scalar_lea.sflag [#allocation3], %s361_s29 }
 0x106   : > { %p473_p2 = pnand %p476_p1, %p642_p6 }
 0x108   : > { %557 = dma.done.wait (!%p473_p2), %s362_s30, 128  }
 0x109   : > { %559 = vsyncadd (!%p473_p2), %s362_s30, 4294967168  ;;  %p13_p3 = scmp.ge.s32.totalorder %s625_s18, 4   ;;  %s733_s12 = smov %s566_s13 }
 0x10a   : > { %s734_s13 = smov %s570_s14  ;;  %s735_s14 = smov %s636_s21 }
 0x10b   : > { %s736_s15 = smov %s625_s18  ;;  %15 = sbr.rel (!%p13_p3) target bundleno = 3 (0x3), region = 68 }
 0x112   :  { %367 = vsyncpa [#allocation3], 1 }
 0x113   :  { %369 = vsyncpa [#allocation3 + $0x1], 1 }

</bundles_post_ra>
